<compile_context>
chip_gen: v5e
topology: v5e:2x2
jax: 0.10.0
libtpu: 0.0.40
codegen_flags: <defaults>
</compile_context>

<pallas_src>
import functools

import numpy as np

import jax
import jax.numpy as jnp
from jax.experimental import pallas as pl
from jax.experimental.pallas import tpu as pltpu


# ---------------------------------------------------------------------------
# helpers
# ---------------------------------------------------------------------------
def _round_up(x, m):
    return ((x + m - 1) // m) * m


def _pad2d(x, rows, cols):
    pr, pc = rows - x.shape[0], cols - x.shape[1]
    if pr or pc:
        x = jnp.pad(x, ((0, pr), (0, pc)))
    return x


def _chip_params():
    """Generation-aware knobs: per-core VMEM cap, megacore split, tile defaults."""
    try:
        kind = jax.devices()[0].device_kind.lower()
    except Exception:
        kind = ""
    if "v7" in kind:
        # v7x: 64 MiB physical VMEM per TensorCore -> leave headroom; 2 TCs.
        return {"vmem_cap": 48 << 20, "multi_core": True, "tm_default": 512}
    if "v6" in kind or "v5" in kind:
        # v5e / v6e: 128 MiB VMEM, single TensorCore -> bigger tiles are fine.
        return {"vmem_cap": 100 << 20, "multi_core": False, "tm_default": 1024}
    # Unknown chip: conservative settings that are safe everywhere.
    return {"vmem_cap": 48 << 20, "multi_core": False, "tm_default": 512}


def _choose_adj_tiles(M, K, Doutp, cbytes, params):
    tm = min(params["tm_default"], _round_up(M, 128))
    tk = min(512, _round_up(K, 128))
    # Only force >=2 row blocks on chips with 2 TensorCores (v7x); on v5e/v6e a
    # single large row block avoids pure reduction-axis overhead.
    if params["multi_core"] and _round_up(M, 128) > 128 and pl.cdiv(_round_up(M, 128), tm) < 2:
        tm = max(128, _round_up(pl.cdiv(M, 2), 128))

    def est(tm_, tk_):
        return (2 * tm_ * tk_ * cbytes        # adj tile (double-buffered)
                + 2 * tk_ * Doutp * cbytes    # XW tile
                + 2 * tm_ * Doutp * 4         # output tile (f32 worst case)
                + tm_ * Doutp * 4)            # optional acc scratch

    budget = int(params["vmem_cap"] * 0.6)
    while est(tm, tk) > budget and tk > 128:
        tk = max(128, _round_up(tk // 2, 128))
    while est(tm, tk) > budget and tm > 128:
        tm = max(128, _round_up(tm // 2, 128))
    return tm, tk


# ---------------------------------------------------------------------------
# Kernel 1: XW = inputs @ W   (standard tiled matmul, f32 accumulation)
# ---------------------------------------------------------------------------
def _xw_kernel(x_ref, w_ref, o_ref, acc_ref):
    @pl.when(pl.program_id(1) == 0)
    def _():
        acc_ref[...] = jnp.zeros_like(acc_ref)

    acc_ref[...] += jnp.dot(x_ref[...], w_ref[...],
                            preferred_element_type=jnp.float32)

    @pl.when(pl.program_id(1) == pl.num_programs(1) - 1)
    def _():
        o_ref[...] = acc_ref[...].astype(o_ref.dtype)


def _xw_matmul(x_p, w_p, *, tm, tdi, vmem_cap):
    Kp, Dinp = x_p.shape
    _, Doutp = w_p.shape
    cbytes = jnp.dtype(x_p.dtype).itemsize
    n_i, n_k = Kp // tm, Dinp // tdi

    vmem_est = (2 * tm * tdi + 2 * tdi * Doutp + 2 * tm * Doutp) * cbytes \
        + tm * Doutp * 4
    vmem_limit = min(max(int(vmem_est * 1.5) + (4 << 20), 32 << 20), vmem_cap)

    cost = pl.CostEstimate(
        flops=2 * Kp * Dinp * Doutp,
        transcendentals=0,
        bytes_accessed=(Kp * Dinp + Dinp * Doutp * n_i + Kp * Doutp) * cbytes,
    )

    return pl.pallas_call(
        _xw_kernel,
        out_shape=jax.ShapeDtypeStruct((Kp, Doutp), x_p.dtype),
        grid_spec=pltpu.PrefetchScalarGridSpec(
            num_scalar_prefetch=0,
            grid=(n_i, n_k),
            in_specs=[
                pl.BlockSpec((tm, tdi), lambda i, k: (i, k)),
                pl.BlockSpec((tdi, Doutp), lambda i, k: (k, 0)),
            ],
            out_specs=pl.BlockSpec((tm, Doutp), lambda i, k: (i, 0)),
            scratch_shapes=[pltpu.VMEM((tm, Doutp), jnp.float32)],
        ),
        compiler_params=pltpu.CompilerParams(
            dimension_semantics=("parallel", "arbitrary"),
            vmem_limit_bytes=vmem_limit,
        ),
        cost_estimate=cost,
    )(x_p, w_p)


# ---------------------------------------------------------------------------
# Kernel 2: out = ELU?(adj @ XW), block-sparse over adjacency tiles.
#   Scalar-prefetched:  kblk[i, k] = k-block index of the k-th non-empty
#   adjacency block in row block i (padded by repeating the last valid index
#   so the padded DMAs dedup); cnt[i] = number of non-empty blocks.
# ---------------------------------------------------------------------------
def _adj_xw_kernel(kblk_ref, cnt_ref, adj_ref, xw_ref, o_ref, *scratch,
                   apply_elu):
    acc_ref = scratch[0] if scratch else o_ref   # f32 out -> accumulate in place
    i = pl.program_id(0)
    k = pl.program_id(1)

    @pl.when(k == 0)
    def _():
        acc_ref[...] = jnp.zeros_like(acc_ref)

    # Skip all-zero adjacency blocks.
    @pl.when(k < cnt_ref[i])
    def _():
        acc_ref[...] += jnp.dot(adj_ref[...], xw_ref[...],
                                preferred_element_type=jnp.float32)

    @pl.when(k == pl.num_programs(1) - 1)
    def _():
        acc = acc_ref[...]
        if apply_elu:
            # ELU(alpha=1): x if x > 0 else exp(x) - 1
            acc = jnp.where(acc > 0, acc, jnp.exp(acc) - 1.0)
        o_ref[...] = acc.astype(o_ref.dtype)


def _adj_spmm(adj_p, xw_p, kblk, cnt, *, tm, tk, out_dtype, apply_elu, vmem_cap):
    Mp, Kp = adj_p.shape
    _, Doutp = xw_p.shape
    n_i = Mp // tm
    max_cnt = int(kblk.shape[1])
    cbytes = jnp.dtype(adj_p.dtype).itemsize
    obytes = jnp.dtype(out_dtype).itemsize

    use_scratch = jnp.dtype(out_dtype) != jnp.dtype(jnp.float32)
    scratch_shapes = [pltpu.VMEM((tm, Doutp), jnp.float32)] if use_scratch else []

    vmem_est = (2 * tm * tk * cbytes + 2 * tk * Doutp * cbytes
                + 2 * tm * Doutp * obytes
                + (tm * Doutp * 4 if use_scratch else 0))
    vmem_limit = min(max(int(vmem_est * 1.5) + (4 << 20), 32 << 20), vmem_cap)

    cost = pl.CostEstimate(
        flops=2 * n_i * max_cnt * tm * tk * Doutp,
        transcendentals=Mp * Doutp if apply_elu else 0,
        bytes_accessed=(n_i * max_cnt * (tm * tk + tk * Doutp) * cbytes
                        + Mp * Doutp * obytes),
    )

    kernel = functools.partial(_adj_xw_kernel, apply_elu=apply_elu)
    return pl.pallas_call(
        kernel,
        out_shape=jax.ShapeDtypeStruct((Mp, Doutp), out_dtype),
        grid_spec=pltpu.PrefetchScalarGridSpec(
            num_scalar_prefetch=2,
            grid=(n_i, max_cnt),
            in_specs=[
                pl.BlockSpec((tm, tk),
                             lambda i, k, kblk_r, cnt_r: (i, kblk_r[i, k])),
                pl.BlockSpec((tk, Doutp),
                             lambda i, k, kblk_r, cnt_r: (kblk_r[i, k], 0)),
            ],
            out_specs=pl.BlockSpec((tm, Doutp),
                                   lambda i, k, kblk_r, cnt_r: (i, 0)),
            scratch_shapes=scratch_shapes,
        ),
        compiler_params=pltpu.CompilerParams(
            dimension_semantics=("parallel", "arbitrary"),
            vmem_limit_bytes=vmem_limit,
        ),
        cost_estimate=cost,
    )(kblk, cnt, adj_p, xw_p)


# ---------------------------------------------------------------------------
# GraphConvSparse module equivalent.
# ---------------------------------------------------------------------------
class GraphConvSparse:
    def __init__(self, input_dim, output_dim, adj, activation=True, *, key=None,
                 compute_dtype=jnp.bfloat16):
        if key is None:
            key = jax.random.PRNGKey(0)
        # glorot_init: uniform in [-r, r] with r = sqrt(6 / (in + out))
        init_range = float(np.sqrt(6.0 / (input_dim + output_dim)))
        self.weight = jax.random.uniform(
            key, (input_dim, output_dim), dtype=jnp.float32,
            minval=-init_range, maxval=init_range,
        )
        self.activation = activation
        self.compute_dtype = compute_dtype
        self.input_dim = input_dim
        self.output_dim = output_dim
        self._params = _chip_params()

        # ---- one-time adjacency preparation (hoisted out of forward) -------
        adj_np = np.asarray(jax.device_get(adj), dtype=np.float32)
        M, K = adj_np.shape
        self.M, self.K = M, K
        self.Doutp = _round_up(output_dim, 128)   # lane-dense output
        cbytes = jnp.dtype(compute_dtype).itemsize
        self.tm, self.tk = _choose_adj_tiles(M, K, self.Doutp, cbytes, self._params)
        self.Mp = _round_up(M, self.tm)
        self.Kp = _round_up(K, self.tk)

        adj_pad = np.zeros((self.Mp, self.Kp), dtype=np.float32)
        adj_pad[:M, :K] = adj_np
        n_i, n_k = self.Mp // self.tm, self.Kp // self.tk

        # Block-sparsity metadata for the scalar-prefetch path.
        blk_nz = np.abs(adj_pad).reshape(n_i, self.tm, n_k, self.tk) \
                   .sum(axis=(1, 3)) > 0.0
        cnt = blk_nz.sum(axis=1).astype(np.int32)
        max_cnt = max(int(cnt.max()), 1)
        kblk = np.zeros((n_i, max_cnt), dtype=np.int32)
        for i in range(n_i):
            idx = np.nonzero(blk_nz[i])[0].astype(np.int32)
            kblk[i, :idx.size] = idx
            if idx.size:
                kblk[i, idx.size:] = idx[-1]   # repeat last -> DMA dedup on pad

        self.adj_p = jnp.asarray(adj_pad).astype(compute_dtype)
        self.kblk = jnp.asarray(kblk)
        self.cnt = jnp.asarray(cnt)

    def __call__(self, inputs):
        assert inputs.shape == (self.K, self.input_dim), "input shape mismatch"
        out_dtype = inputs.dtype
        cd = self.compute_dtype

        Dinp = _round_up(self.input_dim, 128)
        tdi = 128
        for cand in (512, 384, 256, 128):
            if Dinp % cand == 0:
                tdi = cand
                break

        x_p = _pad2d(inputs, self.Kp, Dinp).astype(cd)
        w_p = _pad2d(self.weight, Dinp, self.Doutp).astype(cd)

        # Stage 1: XW computed once (no per-row-block recompute / re-stream).
        xw = _xw_matmul(x_p, w_p, tm=self.tk, tdi=tdi,
                        vmem_cap=self._params["vmem_cap"])

        # Stage 2: block-sparse adj @ XW with fused ELU.
        out_p = _adj_spmm(self.adj_p, xw, self.kblk, self.cnt,
                          tm=self.tm, tk=self.tk,
                          out_dtype=out_dtype, apply_elu=self.activation,
                          vmem_cap=self._params["vmem_cap"])
        return out_p[:self.M, :self.output_dim]


# ---------------------------------------------------------------------------
# Reference (plain JAX) matching the kernel's bf16-operand / f32-accumulate
# numerics, for the correctness check.
# ---------------------------------------------------------------------------
def _reference(inputs, weight, adj, activation, compute_dtype=jnp.bfloat16):
    cd = compute_dtype
    xw = jnp.dot(inputs.astype(cd), weight.astype(cd),
                 preferred_element_type=jnp.float32)
    x = jnp.dot(adj.astype(cd), xw.astype(cd),
                preferred_element_type=jnp.float32)
    if activation:
        x = jnp.where(x > 0, x, jnp.exp(x) - 1.0)
    return x.astype(inputs.dtype)


if __name__ == "__main__":
    key = jax.random.PRNGKey(0)
    k_adj, k_x, k_w = jax.random.split(key, 3)

    N = 256           # number of graph nodes
    INPUT_DIM = 256   # input feature dim
    OUTPUT_DIM = 128  # output feature dim

    # dense adjacency (normalized-ish random), node features
    adj = jax.random.uniform(k_adj, (N, N), dtype=jnp.float32) / N
    inputs = jax.random.normal(k_x, (N, INPUT_DIM), dtype=jnp.float32)

    layer = GraphConvSparse(INPUT_DIM, OUTPUT_DIM, adj, activation=True, key=k_w)

    out = layer(inputs)
    out = jax.block_until_ready(out)

    ref = _reference(inputs, layer.weight, adj, True)
    assert out.shape == (N, OUTPUT_DIM)
    assert out.dtype == inputs.dtype
    assert jnp.allclose(out, ref, atol=2e-2, rtol=2e-2), "mismatch vs reference"

    print("KERNEL_OK")
</pallas_src>

<mosaic_0001>
module attributes {stable_mosaic.version = 11 : i64} {
  func.func @_xw_kernel(%arg0: i32, %arg1: i32, %arg2: memref<256x256xbf16, #tpu.memory_space<vmem>>, %arg3: memref<256x128xbf16, #tpu.memory_space<vmem>>, %arg4: memref<256x128xbf16, #tpu.memory_space<vmem>>, %arg5: memref<256x128xf32, #tpu.memory_space<vmem>>) attributes {dimension_semantics = [#tpu.dimension_semantics<parallel>, #tpu.dimension_semantics<arbitrary>], iteration_bounds = array<i64: 1, 1>, scalar_prefetch = 0 : i64, scratch_operands = 1 : i64, tpu.core_type = #tpu.core_type<tc>, window_params = [{transform_indices = @transform_0, window_bounds = array<i64: 256, 256>}, {transform_indices = @transform_1, window_bounds = array<i64: 256, 128>}, {transform_indices = @transform_2, window_bounds = array<i64: 256, 128>}]} {
    %c0_i32 = arith.constant 0 : i32
    %0 = arith.cmpi eq, %arg1, %c0_i32 : i32
    %1 = arith.extui %0 : i1 to i32
    %c0_i32_0 = arith.constant 0 : i32
    %2 = arith.cmpi ne, %1, %c0_i32_0 : i32
    scf.if %2 {
      %cst_10 = arith.constant 0.000000e+00 : f32
      %12 = vector.broadcast %cst_10 : f32 to vector<256x128xf32>
      %c0_11 = arith.constant 0 : index
      %c0_12 = arith.constant 0 : index
      %13 = vector.load %arg5[%c0_11, %c0_12] : memref<256x128xf32, #tpu.memory_space<vmem>>, vector<256x128xf32>
      tpu.vector_store %arg5[%c0_11, %c0_12], %12 {strides = array<i32>} : memref<256x128xf32, #tpu.memory_space<vmem>>, vector<256x128xf32>,
    } else {
    }
    %c0 = arith.constant 0 : index
    %c0_1 = arith.constant 0 : index
    %3 = vector.load %arg5[%c0, %c0_1] : memref<256x128xf32, #tpu.memory_space<vmem>>, vector<256x128xf32>
    %c0_2 = arith.constant 0 : index
    %c0_3 = arith.constant 0 : index
    %4 = vector.load %arg2[%c0_2, %c0_3] : memref<256x256xbf16, #tpu.memory_space<vmem>>, vector<256x256xbf16>
    %c0_4 = arith.constant 0 : index
    %c0_5 = arith.constant 0 : index
    %5 = vector.load %arg3[%c0_4, %c0_5] : memref<256x128xbf16, #tpu.memory_space<vmem>>, vector<256x128xbf16>
    %cst = arith.constant dense<0.000000e+00> : vector<256x128xf32>
    %6 = tpu.matmul %4, %5, %cst {dimension_numbers = #tpu.dot_dimension_numbers<[1], [0], [0], [1], [0, 0, 1, 1], [], []>} : vector<256x256xbf16>, vector<256x128xbf16>, vector<256x128xf32> -> vector<256x128xf32>
    %7 = arith.addf %3, %6 : vector<256x128xf32>
    %c0_6 = arith.constant 0 : index
    %c0_7 = arith.constant 0 : index
    %8 = vector.load %arg5[%c0_6, %c0_7] : memref<256x128xf32, #tpu.memory_space<vmem>>, vector<256x128xf32>
    tpu.vector_store %arg5[%c0_6, %c0_7], %7 {strides = array<i32>} : memref<256x128xf32, #tpu.memory_space<vmem>>, vector<256x128xf32>,
    %c0_i32_8 = arith.constant 0 : i32
    %9 = arith.cmpi eq, %arg1, %c0_i32_8 : i32
    %10 = arith.extui %9 : i1 to i32
    %c0_i32_9 = arith.constant 0 : i32
    %11 = arith.cmpi ne, %10, %c0_i32_9 : i32
    scf.if %11 {
      %c0_10 = arith.constant 0 : index
      %c0_11 = arith.constant 0 : index
      %12 = vector.load %arg5[%c0_10, %c0_11] : memref<256x128xf32, #tpu.memory_space<vmem>>, vector<256x128xf32>
      %13 = arith.truncf %12 : vector<256x128xf32> to vector<256x128xbf16>
      %c0_12 = arith.constant 0 : index
      %c0_13 = arith.constant 0 : index
      %14 = vector.load %arg4[%c0_12, %c0_13] : memref<256x128xbf16, #tpu.memory_space<vmem>>, vector<256x128xbf16>
      tpu.vector_store %arg4[%c0_12, %c0_13], %13 {strides = array<i32>} : memref<256x128xbf16, #tpu.memory_space<vmem>>, vector<256x128xbf16>,
    } else {
    }
    return
  }
  func.func @transform_0(%arg0: i32, %arg1: i32) -> (i32, i32) {
    %c0_i32 = arith.constant 0 : i32
    return %arg0, %arg1 : i32, i32
  }
  func.func @transform_1(%arg0: i32, %arg1: i32) -> (i32, i32) {
    %c0_i32 = arith.constant 0 : i32
    %c0_i32_0 = arith.constant 0 : i32
    return %arg1, %c0_i32 : i32, i32
  }
  func.func @transform_2(%arg0: i32, %arg1: i32) -> (i32, i32) {
    %c0_i32 = arith.constant 0 : i32
    %c0_i32_0 = arith.constant 0 : i32
    return %arg0, %c0_i32 : i32, i32
  }
}

</mosaic_0001>

<bundles_post_ra>
// kernel: tpu_custom_call.1
= control target key start
LH: loop header
LB: loop body
LE: loop exit
PB: predicated region body
PF: predicated region fallthrough
CT: control target
= control target key end

     0   :  { %7 = vsyncpa [#allocation4], 0  ;;  %s1266_s0 = inlined_call_operand.hbm [shape: bf16[256,256], index: 0, kind: input, shape index: {}]   ;;  %s1267_s1 = inlined_call_operand.hbm [shape: bf16[256,128], index: 1, kind: input, shape index: {}]   ;;  %s1268_s2 = inlined_call_operand.hbm [shape: bf16[256,128], index: 2, kind: output, shape index: {}]  }
   0x1   :  { %8 = vsyncpa [#allocation7], 0 }
   0x2   :  { %9 = vsyncpa [#allocation5], 0  ;;  %s14_s11 = sshll.u32 %s1266_s0, 4  ;;  %s1229_s12 = smov [#allocation3]   ;;  %s15_s11 = int_to_ptr.hbm [resolvable:$true] %s14_s11 }
   0x3   :  { %s16_s13 = sshll.u32 %s1229_s12, 4  ;;  %s27_s16 = sshll.u32 %s1267_s1, 4  ;;  %s17_s13 = int_to_ptr.vmem [resolvable:$true] %s16_s13  ;;  %s28_s16 = int_to_ptr.hbm [resolvable:$true] %s27_s16 }
   0x4   :  { %s1230_s17 = smov 128   ;;  %s1231_s18 = smov 8  }
   0x5   :  { %22 = dma.hbm_to_vmem [thread:$0]  %s15_s11, 4096, %s17_s13, [#allocation4], %s1230_s17, %s1230_s17, %s1231_s18  }
   0x6   :  { %s1232_s19 = smov [#allocation6]   ;;  %s1233_s21 = smov 64  }
   0x7   :  { %s29_s20 = sshll.u32 %s1232_s19, 4  ;;  %s1234_s22 = smov 4   ;;  %s30_s20 = int_to_ptr.vmem [resolvable:$true] %s29_s20 }
   0x8   :  { %35 = dma.hbm_to_vmem [thread:$0]  %s28_s16, 2048, %s30_s20, [#allocation7], %s1233_s21, %s1233_s21, %s1234_s22  }
   0x9   :  { %1223 = dma.done.wait [#allocation4], 4096  }
   0xa   :  { %1224 = vsyncadd [#allocation4], 4294963200 }
   0xb   :  { %1225 = dma.done.wait [#allocation7], 2048  }
   0xc   :  { %1226 = vsyncadd [#allocation7], 4294965248  ;;  %v1024_v0 = vld [vmem:[#allocation6 + $0x38] sm:$0xff]  ;;  %v1023_v2 = vld [vmem:[#allocation6 + $0x30] sm:$0xff]  ;;  %s1235_s0 = smov [#allocation8]   ;;  %s779_s25 = sshll.u32 %s1268_s2, 4  ;;  %s780_s25 = int_to_ptr.hbm [resolvable:$true] %s779_s25 }
   0xd   :  { %v1032_v1 = vld [vmem:[#allocation6 + $0x78] sm:$0xff]  ;;  %432 = vmatpush.bf16.msra.mxu0 %v1024_v0  ;;  %1128 = vmatpush.bf16.msra.mxu2 %v1024_v0  ;;  %v1031_v3 = vld [vmem:[#allocation6 + $0x70] sm:$0xff]  ;;  %v1022_v4 = vld [vmem:[#allocation6 + $0x28] sm:$0xff]  ;;  %s777_s1 = sshll.u32 %s1235_s0, 4  ;;  %s778_s1 = int_to_ptr.vmem [resolvable:$true] %s777_s1 }
   0xe   :  { %521 = vmatpush.bf16.msra.mxu1 %v1032_v1  ;;  %1136 = vmatpush.bf16.msra.mxu3 %v1032_v1  ;;  %v1030_v5 = vld [vmem:[#allocation6 + $0x68] sm:$0xff]  ;;  %v1021_v6 = vld [vmem:[#allocation6 + $0x20] sm:$0xff]  ;;  %v1020_v8 = vld [vmem:[#allocation6 + $0x18] sm:$0xff] }
   0xf   :  { %v1029_v7 = vld [vmem:[#allocation6 + $0x60] sm:$0xff]  ;;  %v1028_v9 = vld [vmem:[#allocation6 + $0x58] sm:$0xff]  ;;  %v1019_v10 = vld [vmem:[#allocation6 + $0x10] sm:$0xff] }
  0x10   :  { %v1027_v11 = vld [vmem:[#allocation6 + $0x50] sm:$0xff]  ;;  %v1018_v12 = vld [vmem:[#allocation6 + $0x8] sm:$0xff]  ;;  %v1017_v14 = vld [vmem:[#allocation6] sm:$0xff] }
  0x11   :  { %433 = vmatpush.bf16.msra.mxu0 %v1023_v2  ;;  %1129 = vmatpush.bf16.msra.mxu2 %v1023_v2  ;;  %v1026_v13 = vld [vmem:[#allocation6 + $0x48] sm:$0xff]  ;;  %v1025_v15 = vld [vmem:[#allocation6 + $0x40] sm:$0xff]  ;;  %v803_v28 = vld [vmem:[#allocation3 + $0x10] sm:$0xf] }
  0x12   :  { %522 = vmatpush.bf16.msra.mxu1 %v1031_v3  ;;  %1137 = vmatpush.bf16.msra.mxu3 %v1031_v3  ;;  %v795_v16 = vld [vmem:[#allocation3] sm:$0xf]  ;;  %v986_v17 = vld [vmem:[#allocation3 + $0x4] sm:$0xf0]  ;;  %v985_v20 = vld [vmem:[#allocation3 + $0x4] sm:$0xf] }
  0x13   :  { %v859_v18 = vld [vmem:[#allocation3 + $0x80] sm:$0xf]  ;;  %v1002_v19 = vld [vmem:[#allocation3 + $0x84] sm:$0xf0]  ;;  %v797_v21 = vld [vmem:[#allocation3 + $0x8] sm:$0xf0]  ;;  %v796_v24 = vor.u32 %v986_v17, %v795_v16 }
  0x14   :  { %v1001_v22 = vld [vmem:[#allocation3 + $0x84] sm:$0xf]  ;;  %v861_v23 = vld [vmem:[#allocation3 + $0x88] sm:$0xf0]  ;;  %v860_v25 = vor.u32 %v1002_v19, %v859_v18  ;;  %v800_v26 = vor.u32 %v985_v20, %v797_v21  ;;  %v988_v29 = vld [vmem:[#allocation3 + $0x14] sm:$0xf0] }
  0x15   :  { %434 = vmatpush.bf16.msra.mxu0 %v1022_v4  ;;  %1130 = vmatpush.bf16.msra.mxu2 %v1022_v4  ;;  %v864_v27 = vor.u32 %v1001_v22, %v861_v23  ;;  %v867_v30 = vld [vmem:[#allocation3 + $0x90] sm:$0xf]  ;;  %v1004_v31 = vld [vmem:[#allocation3 + $0x94] sm:$0xf0]  ;;  %v987_v32 = vld [vmem:[#allocation3 + $0x14] sm:$0xf]  ;;  %v804_v36 = vor.u32 %v988_v29, %v803_v28 }
  0x16   :  { %523 = vmatpush.bf16.msra.mxu1 %v1030_v5  ;;  %1138 = vmatpush.bf16.msra.mxu3 %v1030_v5  ;;  %v805_v33 = vld [vmem:[#allocation3 + $0x18] sm:$0xf0]  ;;  %v1003_v34 = vld [vmem:[#allocation3 + $0x94] sm:$0xf]  ;;  %v868_v37 = vor.u32 %v1004_v31, %v867_v30  ;;  %v811_v40 = vld [vmem:[#allocation3 + $0x20] sm:$0xf] }
  0x17   :  { %v869_v35 = vld [vmem:[#allocation3 + $0x98] sm:$0xf0]  ;;  %v808_v38 = vor.u32 %v987_v32, %v805_v33  ;;  %v990_v41 = vld [vmem:[#allocation3 + $0x24] sm:$0xf0]  ;;  %v875_v42 = vld [vmem:[#allocation3 + $0xa0] sm:$0xf] }
  0x18   :  { %v872_v39 = vor.u32 %v1003_v34, %v869_v35  ;;  %v1006_v43 = vld [vmem:[#allocation3 + $0xa4] sm:$0xf0]  ;;  %v989_v44 = vld [vmem:[#allocation3 + $0x24] sm:$0xf]  ;;  %v813_v45 = vld [vmem:[#allocation3 + $0x28] sm:$0xf0]  ;;  %v812_v48 = vor.u32 %v990_v41, %v811_v40 }
  0x19   :  { %435 = vmatpush.bf16.msra.mxu0 %v1021_v6  ;;  %1131 = vmatpush.bf16.msra.mxu2 %v1021_v6  ;;  %v1005_v46 = vld [vmem:[#allocation3 + $0xa4] sm:$0xf]  ;;  %v877_v47 = vld [vmem:[#allocation3 + $0xa8] sm:$0xf0]  ;;  %v876_v49 = vor.u32 %v1006_v43, %v875_v42  ;;  %v816_v50 = vor.u32 %v989_v44, %v813_v45  ;;  %v819_v52 = vld [vmem:[#allocation3 + $0x30] sm:$0xf] }
  0x1a   :  { %524 = vmatpush.bf16.msra.mxu1 %v1029_v7  ;;  %1139 = vmatpush.bf16.msra.mxu3 %v1029_v7  ;;  %v880_v51 = vor.u32 %v1005_v46, %v877_v47  ;;  %v992_v53 = vld [vmem:[#allocation3 + $0x34] sm:$0xf0]  ;;  %v883_v54 = vld [vmem:[#allocation3 + $0xb0] sm:$0xf]  ;;  %v991_v56 = vld [vmem:[#allocation3 + $0x34] sm:$0xf] }
  0x1b   :  { %v1008_v55 = vld [vmem:[#allocation3 + $0xb4] sm:$0xf0]  ;;  %v821_v57 = vld [vmem:[#allocation3 + $0x38] sm:$0xf0]  ;;  %v1007_v58 = vld [vmem:[#allocation3 + $0xb4] sm:$0xf]  ;;  %v820_v60 = vor.u32 %v992_v53, %v819_v52 }
  0x1c   :  { %v885_v59 = vld [vmem:[#allocation3 + $0xb8] sm:$0xf0]  ;;  %v884_v61 = vor.u32 %v1008_v55, %v883_v54  ;;  %v824_v62 = vor.u32 %v991_v56, %v821_v57  ;;  %v827_v0 = vld [vmem:[#allocation3 + $0x40] sm:$0xf]  ;;  %v994_v1 = vld [vmem:[#allocation3 + $0x44] sm:$0xf0] }
  0x1d   :  { %436 = vmatpush.bf16.msra.mxu0 %v1020_v8  ;;  %1132 = vmatpush.bf16.msra.mxu2 %v1020_v8  ;;  %v888_v63 = vor.u32 %v1007_v58, %v885_v59  ;;  %v891_v2 = vld [vmem:[#allocation3 + $0xc0] sm:$0xf]  ;;  %v1010_v3 = vld [vmem:[#allocation3 + $0xc4] sm:$0xf0]  ;;  %v993_v4 = vld [vmem:[#allocation3 + $0x44] sm:$0xf]  ;;  %v828_v8 = vor.u32 %v994_v1, %v827_v0 }
  0x1e   :  { %525 = vmatpush.bf16.msra.mxu1 %v1028_v9  ;;  %1140 = vmatpush.bf16.msra.mxu3 %v1028_v9  ;;  %v829_v5 = vld [vmem:[#allocation3 + $0x48] sm:$0xf0]  ;;  %v1009_v6 = vld [vmem:[#allocation3 + $0xc4] sm:$0xf]  ;;  %v892_v9 = vor.u32 %v1010_v3, %v891_v2  ;;  %v995_v16 = vld [vmem:[#allocation3 + $0x54] sm:$0xf] }
  0x1f   :  { %v893_v7 = vld [vmem:[#allocation3 + $0xc8] sm:$0xf0]  ;;  %v837_v17 = vld [vmem:[#allocation3 + $0x58] sm:$0xf0]  ;;  %v1011_v18 = vld [vmem:[#allocation3 + $0xd4] sm:$0xf] }
  0x20   :  { %v901_v19 = vld [vmem:[#allocation3 + $0xd8] sm:$0xf0]  ;;  %v840_v22 = vor.u32 %v995_v16, %v837_v17  ;;  %v997_v28 = vld [vmem:[#allocation3 + $0x64] sm:$0xf]  ;;  %v845_v29 = vld [vmem:[#allocation3 + $0x68] sm:$0xf0] }
  0x21   :  { %437 = vmatpush.bf16.msra.mxu0 %v1019_v10  ;;  %1133 = vmatpush.bf16.msra.mxu2 %v1019_v10  ;;  %v832_v10 = vor.u32 %v993_v4, %v829_v5  ;;  %v904_v23 = vor.u32 %v1011_v18, %v901_v19  ;;  %v1013_v30 = vld [vmem:[#allocation3 + $0xe4] sm:$0xf]  ;;  %v909_v31 = vld [vmem:[#allocation3 + $0xe8] sm:$0xf0]  ;;  %v848_v34 = vor.u32 %v997_v28, %v845_v29  ;;  %v999_v40 = vld [vmem:[#allocation3 + $0x74] sm:$0xf] }
  0x22   :  { %526 = vmatpush.bf16.msra.mxu1 %v1027_v11  ;;  %1141 = vmatpush.bf16.msra.mxu3 %v1027_v11  ;;  %v896_v11 = vor.u32 %v1009_v6, %v893_v7  ;;  %v912_v35 = vor.u32 %v1013_v30, %v909_v31  ;;  %v853_v41 = vld [vmem:[#allocation3 + $0x78] sm:$0xf0]  ;;  %v1015_v42 = vld [vmem:[#allocation3 + $0xf4] sm:$0xf] }
  0x23   :  { %v917_v43 = vld [vmem:[#allocation3 + $0xf8] sm:$0xf0]  ;;  %v856_v46 = vor.u32 %v999_v40, %v853_v41 }
  0x24   :  { %v920_v47 = vor.u32 %v1015_v42, %v917_v43 }
  0x25   :  { %438 = vmatpush.bf16.msra.mxu0 %v1018_v12  ;;  %1134 = vmatpush.bf16.msra.mxu2 %v1018_v12  ;;  %v835_v12 = vld [vmem:[#allocation3 + $0x50] sm:$0xf] }
  0x26   :  { %527 = vmatpush.bf16.msra.mxu1 %v1026_v13  ;;  %1142 = vmatpush.bf16.msra.mxu3 %v1026_v13  ;;  %v996_v13 = vld [vmem:[#allocation3 + $0x54] sm:$0xf0] }
  0x27   :  { %v836_v20 = vor.u32 %v996_v13, %v835_v12 }
  0x29   :  { %439 = vmatpush.bf16.msra.mxu0 %v1017_v14  ;;  %1135 = vmatpush.bf16.msra.mxu2 %v1017_v14  ;;  %v899_v14 = vld [vmem:[#allocation3 + $0xd0] sm:$0xf] }
  0x2a   :  { %528 = vmatpush.bf16.msra.mxu1 %v1025_v15  ;;  %1143 = vmatpush.bf16.msra.mxu3 %v1025_v15  ;;  %v1012_v15 = vld [vmem:[#allocation3 + $0xd4] sm:$0xf0] }
  0x2b   :  { %v900_v21 = vor.u32 %v1012_v15, %v899_v14 }
  0x2c   :  { %440 = vmatmul.bf16.vlgmr.msra.gmra.mxu0 %v796_v24  ;;  %480 = vmatmul.bf16.vlgmr.msra.gmra.mxu2 %v860_v25  ;;  %v843_v24 = vld [vmem:[#allocation3 + $0x60] sm:$0xf]  ;;  %v998_v25 = vld [vmem:[#allocation3 + $0x64] sm:$0xf0] }
  0x2d   :  { %529 = vmatmul.bf16.vlgmr.msra.gmra.mxu1 %v800_v26  ;;  %569 = vmatmul.bf16.vlgmr.msra.gmra.mxu3 %v864_v27  ;;  %v907_v26 = vld [vmem:[#allocation3 + $0xe0] sm:$0xf]  ;;  %v1014_v27 = vld [vmem:[#allocation3 + $0xe4] sm:$0xf0]  ;;  %v844_v32 = vor.u32 %v998_v25, %v843_v24 }
  0x2e   :  { %v908_v33 = vor.u32 %v1014_v27, %v907_v26 }
  0x3c   :  { %445 = vmatmul.bf16.gmra.mxu0 %v804_v36  ;;  %485 = vmatmul.bf16.gmra.mxu2 %v868_v37  ;;  %v851_v36 = vld [vmem:[#allocation3 + $0x70] sm:$0xf]  ;;  %v1000_v37 = vld [vmem:[#allocation3 + $0x74] sm:$0xf0] }
  0x3d   :  { %534 = vmatmul.bf16.gmra.mxu1 %v808_v38  ;;  %574 = vmatmul.bf16.gmra.mxu3 %v872_v39  ;;  %v915_v38 = vld [vmem:[#allocation3 + $0xf0] sm:$0xf]  ;;  %v1016_v39 = vld [vmem:[#allocation3 + $0xf4] sm:$0xf0]  ;;  %v852_v44 = vor.u32 %v1000_v37, %v851_v36 }
  0x3e   :  { %v916_v45 = vor.u32 %v1016_v39, %v915_v38 }
  0x4c   :  { %450 = vmatmul.bf16.gmra.mxu0 %v812_v48  ;;  %490 = vmatmul.bf16.gmra.mxu2 %v876_v49 }
  0x4d   :  { %539 = vmatmul.bf16.gmra.mxu1 %v816_v50  ;;  %579 = vmatmul.bf16.gmra.mxu3 %v880_v51 }
  0x5c   :  { %455 = vmatmul.bf16.gmra.mxu0 %v820_v60  ;;  %495 = vmatmul.bf16.gmra.mxu2 %v884_v61 }
  0x5d   :  { %544 = vmatmul.bf16.gmra.mxu1 %v824_v62  ;;  %584 = vmatmul.bf16.gmra.mxu3 %v888_v63 }
  0x6c   :  { %460 = vmatmul.bf16.gmra.mxu0 %v828_v8  ;;  %500 = vmatmul.bf16.gmra.mxu2 %v892_v9 }
  0x6d   :  { %549 = vmatmul.bf16.gmra.mxu1 %v832_v10  ;;  %589 = vmatmul.bf16.gmra.mxu3 %v896_v11 }
  0x7c   :  { %465 = vmatmul.bf16.gmra.mxu0 %v836_v20  ;;  %505 = vmatmul.bf16.gmra.mxu2 %v900_v21 }
  0x7d   :  { %554 = vmatmul.bf16.gmra.mxu1 %v840_v22  ;;  %594 = vmatmul.bf16.gmra.mxu3 %v904_v23 }
  0x8c   :  { %470 = vmatmul.bf16.gmra.mxu0 %v844_v32  ;;  %510 = vmatmul.bf16.gmra.mxu2 %v908_v33 }
  0x8d   :  { %559 = vmatmul.bf16.gmra.mxu1 %v848_v34  ;;  %599 = vmatmul.bf16.gmra.mxu3 %v912_v35 }
  0x9c   :  { %475 = vmatmul.bf16.gmra.mxu0 %v852_v44  ;;  %515 = vmatmul.bf16.gmra.mxu2 %v916_v45 }
  0x9d   :  { %564 = vmatmul.bf16.gmra.mxu1 %v856_v46  ;;  %604 = vmatmul.bf16.gmra.mxu3 %v920_v47 }
  0xa9   :  { %v441_v48 = vpop.f32.mrf.mxu0 }
  0xaa   :  { %v530_v49 = vpop.f32.mrf.mxu1 }
  0xab   :  { %v531_v54 = vadd.f32 %v530_v49, %v441_v48 }
  0xaf   :  { %v481_v50 = vpop.f32.mrf.mxu2 }
  0xb0   :  { %v570_v51 = vpop.f32.mrf.mxu3 }
  0xb1   :  { %v443_v52 = vpop.f32.mrf.mxu0  ;;  %v571_v59 = vadd.f32 %v570_v51, %v481_v50 }
  0xb2   :  { %v532_v53 = vpop.f32.mrf.mxu1 }
  0xb3   :  { %v533_v55 = vadd.f32 %v532_v53, %v443_v52 }
  0xb5   :  { %v1036_v56 = vpack.c.bf16 %v533_v55, %v531_v54 }
  0xb7   :  { %1037 = vst [vmem:[#allocation8] sm:$0xff] %v1036_v56   ;;  %v483_v57 = vpop.f32.mrf.mxu2 }
  0xb8   :  { %v572_v58 = vpop.f32.mrf.mxu3 }
  0xb9   :  { %v573_v60 = vadd.f32 %v572_v58, %v483_v57  ;;  %v446_v61 = vpop.f32.mrf.mxu0 }
  0xba   :  { %v535_v62 = vpop.f32.mrf.mxu1 }
  0xbb   :  { %v1076_v63 = vpack.c.bf16 %v573_v60, %v571_v59  ;;  %v536_v4 = vadd.f32 %v535_v62, %v446_v61 }
  0xbd   :  { %1120 = vst [vmem:[#allocation8 + $0x40] sm:$0xff] %v1076_v63  }
  0xbf   :  { %v486_v0 = vpop.f32.mrf.mxu2 }
  0xc0   :  { %v575_v1 = vpop.f32.mrf.mxu3 }
  0xc1   :  { %v448_v2 = vpop.f32.mrf.mxu0  ;;  %v576_v9 = vadd.f32 %v575_v1, %v486_v0 }
  0xc2   :  { %v537_v3 = vpop.f32.mrf.mxu1 }
  0xc3   :  { %v538_v5 = vadd.f32 %v537_v3, %v448_v2 }
  0xc5   :  { %v1041_v6 = vpack.c.bf16 %v538_v5, %v536_v4 }
  0xc7   :  { %1113 = vst [vmem:[#allocation8 + $0x8] sm:$0xff] %v1041_v6   ;;  %v488_v7 = vpop.f32.mrf.mxu2 }
  0xc8   :  { %v577_v8 = vpop.f32.mrf.mxu3 }
  0xc9   :  { %v578_v10 = vadd.f32 %v577_v8, %v488_v7  ;;  %v451_v11 = vpop.f32.mrf.mxu0 }
  0xca   :  { %v540_v12 = vpop.f32.mrf.mxu1 }
  0xcb   :  { %v1081_v13 = vpack.c.bf16 %v578_v10, %v576_v9  ;;  %v541_v18 = vadd.f32 %v540_v12, %v451_v11 }
  0xcd   :  { %1121 = vst [vmem:[#allocation8 + $0x48] sm:$0xff] %v1081_v13  }
  0xcf   :  { %v491_v14 = vpop.f32.mrf.mxu2 }
  0xd0   :  { %v580_v15 = vpop.f32.mrf.mxu3 }
  0xd1   :  { %v453_v16 = vpop.f32.mrf.mxu0  ;;  %v581_v23 = vadd.f32 %v580_v15, %v491_v14 }
  0xd2   :  { %v542_v17 = vpop.f32.mrf.mxu1 }
  0xd3   :  { %v543_v19 = vadd.f32 %v542_v17, %v453_v16 }
  0xd5   :  { %v1046_v20 = vpack.c.bf16 %v543_v19, %v541_v18 }
  0xd7   :  { %1114 = vst [vmem:[#allocation8 + $0x10] sm:$0xff] %v1046_v20   ;;  %v493_v21 = vpop.f32.mrf.mxu2 }
  0xd8   :  { %v582_v22 = vpop.f32.mrf.mxu3 }
  0xd9   :  { %v583_v24 = vadd.f32 %v582_v22, %v493_v21  ;;  %v456_v25 = vpop.f32.mrf.mxu0 }
  0xda   :  { %v545_v26 = vpop.f32.mrf.mxu1 }
  0xdb   :  { %v1086_v27 = vpack.c.bf16 %v583_v24, %v581_v23  ;;  %v546_v32 = vadd.f32 %v545_v26, %v456_v25 }
  0xdd   :  { %1122 = vst [vmem:[#allocation8 + $0x50] sm:$0xff] %v1086_v27  }
  0xdf   :  { %v496_v28 = vpop.f32.mrf.mxu2 }
  0xe0   :  { %v585_v29 = vpop.f32.mrf.mxu3 }
  0xe1   :  { %v458_v30 = vpop.f32.mrf.mxu0  ;;  %v586_v37 = vadd.f32 %v585_v29, %v496_v28 }
  0xe2   :  { %v547_v31 = vpop.f32.mrf.mxu1 }
  0xe3   :  { %v548_v33 = vadd.f32 %v547_v31, %v458_v30 }
  0xe5   :  { %v1051_v34 = vpack.c.bf16 %v548_v33, %v546_v32 }
  0xe7   :  { %1115 = vst [vmem:[#allocation8 + $0x18] sm:$0xff] %v1051_v34   ;;  %v498_v35 = vpop.f32.mrf.mxu2 }
  0xe8   :  { %v587_v36 = vpop.f32.mrf.mxu3 }
  0xe9   :  { %v588_v38 = vadd.f32 %v587_v36, %v498_v35  ;;  %v461_v39 = vpop.f32.mrf.mxu0 }
  0xea   :  { %v550_v40 = vpop.f32.mrf.mxu1 }
  0xeb   :  { %v1091_v41 = vpack.c.bf16 %v588_v38, %v586_v37  ;;  %v551_v46 = vadd.f32 %v550_v40, %v461_v39 }
  0xed   :  { %1123 = vst [vmem:[#allocation8 + $0x58] sm:$0xff] %v1091_v41  }
  0xef   :  { %v501_v42 = vpop.f32.mrf.mxu2 }
  0xf0   :  { %v590_v43 = vpop.f32.mrf.mxu3 }
  0xf1   :  { %v463_v44 = vpop.f32.mrf.mxu0  ;;  %v591_v51 = vadd.f32 %v590_v43, %v501_v42 }
  0xf2   :  { %v552_v45 = vpop.f32.mrf.mxu1 }
  0xf3   :  { %v553_v47 = vadd.f32 %v552_v45, %v463_v44 }
  0xf5   :  { %v1056_v48 = vpack.c.bf16 %v553_v47, %v551_v46 }
  0xf7   :  { %1116 = vst [vmem:[#allocation8 + $0x20] sm:$0xff] %v1056_v48   ;;  %v503_v49 = vpop.f32.mrf.mxu2 }
  0xf8   :  { %v592_v50 = vpop.f32.mrf.mxu3 }
  0xf9   :  { %v593_v52 = vadd.f32 %v592_v50, %v503_v49  ;;  %v466_v53 = vpop.f32.mrf.mxu0 }
  0xfa   :  { %v555_v54 = vpop.f32.mrf.mxu1 }
  0xfb   :  { %v1096_v55 = vpack.c.bf16 %v593_v52, %v591_v51  ;;  %v556_v60 = vadd.f32 %v555_v54, %v466_v53 }
  0xfd   :  { %1124 = vst [vmem:[#allocation8 + $0x60] sm:$0xff] %v1096_v55  }
  0xff   :  { %v506_v56 = vpop.f32.mrf.mxu2 }
 0x100   :  { %v595_v57 = vpop.f32.mrf.mxu3 }
 0x101   :  { %v468_v58 = vpop.f32.mrf.mxu0  ;;  %v596_v1 = vadd.f32 %v595_v57, %v506_v56 }
 0x102   :  { %v557_v59 = vpop.f32.mrf.mxu1 }
 0x103   :  { %v558_v61 = vadd.f32 %v557_v59, %v468_v58 }
 0x105   :  { %v1061_v62 = vpack.c.bf16 %v558_v61, %v556_v60 }
 0x107   :  { %1117 = vst [vmem:[#allocation8 + $0x28] sm:$0xff] %v1061_v62   ;;  %v508_v63 = vpop.f32.mrf.mxu2 }
 0x108   :  { %v597_v0 = vpop.f32.mrf.mxu3 }
 0x109   :  { %v598_v2 = vadd.f32 %v597_v0, %v508_v63  ;;  %v471_v3 = vpop.f32.mrf.mxu0 }
 0x10a   :  { %v560_v4 = vpop.f32.mrf.mxu1 }
 0x10b   :  { %v1101_v5 = vpack.c.bf16 %v598_v2, %v596_v1  ;;  %v561_v10 = vadd.f32 %v560_v4, %v471_v3 }
 0x10d   :  { %1125 = vst [vmem:[#allocation8 + $0x68] sm:$0xff] %v1101_v5  }
 0x10f   :  { %v511_v6 = vpop.f32.mrf.mxu2 }
 0x110   :  { %v600_v7 = vpop.f32.mrf.mxu3 }
 0x111   :  { %v473_v8 = vpop.f32.mrf.mxu0  ;;  %v601_v15 = vadd.f32 %v600_v7, %v511_v6 }
 0x112   :  { %v562_v9 = vpop.f32.mrf.mxu1 }
 0x113   :  { %v563_v11 = vadd.f32 %v562_v9, %v473_v8 }
 0x115   :  { %v1066_v12 = vpack.c.bf16 %v563_v11, %v561_v10 }
 0x117   :  { %1118 = vst [vmem:[#allocation8 + $0x30] sm:$0xff] %v1066_v12   ;;  %v513_v13 = vpop.f32.mrf.mxu2 }
 0x118   :  { %v602_v14 = vpop.f32.mrf.mxu3 }
 0x119   :  { %v603_v16 = vadd.f32 %v602_v14, %v513_v13  ;;  %v476_v17 = vpop.f32.mrf.mxu0 }
 0x11a   :  { %v565_v18 = vpop.f32.mrf.mxu1 }
 0x11b   :  { %v1106_v19 = vpack.c.bf16 %v603_v16, %v601_v15  ;;  %v566_v24 = vadd.f32 %v565_v18, %v476_v17 }
 0x11d   :  { %1126 = vst [vmem:[#allocation8 + $0x70] sm:$0xff] %v1106_v19  }
 0x11f   :  { %v516_v20 = vpop.f32.mrf.mxu2 }
 0x120   :  { %v605_v21 = vpop.f32.mrf.mxu3 }
 0x121   :  { %v478_v22 = vpop.f32.mrf.mxu0  ;;  %v606_v29 = vadd.f32 %v605_v21, %v516_v20 }
 0x122   :  { %v567_v23 = vpop.f32.mrf.mxu1 }
 0x123   :  { %v568_v25 = vadd.f32 %v567_v23, %v478_v22 }
 0x125   :  { %v1071_v26 = vpack.c.bf16 %v568_v25, %v566_v24 }
 0x127   :  { %1119 = vst [vmem:[#allocation8 + $0x38] sm:$0xff] %v1071_v26   ;;  %v518_v27 = vpop.f32.mrf.mxu2 }
 0x128   :  { %v607_v28 = vpop.f32.mrf.mxu3 }
 0x129   :  { %v608_v30 = vadd.f32 %v607_v28, %v518_v27 }
 0x12b   :  { %v1111_v31 = vpack.c.bf16 %v608_v30, %v606_v29 }
 0x12d   :  { %1127 = vst [vmem:[#allocation8 + $0x78] sm:$0xff] %v1111_v31  }
 0x12e   :  { %785 = dma.vmem_to_hbm [thread:$0]  %s778_s1, 2048, %s780_s25, [#allocation5], %s1233_s21, %s1233_s21, %s1234_s22  }
 0x12f   :  { %1227 = dma.done.wait [#allocation5], 2048  }
 0x130   :  { %1228 = vsyncadd [#allocation5], 4294965248 }
 0x131   :  { %790 = vsyncpa [#allocation4], 1 }
 0x132   :  { %791 = vsyncpa [#allocation7], 1 }
 0x133   :  { %792 = vsyncpa [#allocation5], 1 }

</bundles_post_ra>
